<compile_context>
chip_gen: v7x
topology: tpu7x:2x2x1
jax: 0.10.0
libtpu: 0.0.40
codegen_flags: <defaults>
</compile_context>

<pallas_src>
import jax
import jax.numpy as jnp
from jax.experimental import pallas as pl
from jax.experimental.pallas import tpu as pltpu

_SUBLANE = 8


def _round_up(n, m):
    return ((n + m - 1) // m) * m


def _feature_kernel(x_ref, w1_ref, b1_ref, w3_ref, b3_ref, o_ref):
    # fc1: relu(x @ W1 + b1). x is downcast per-tile; weights arrive as bf16.
    h = jnp.dot(x_ref[...].astype(jnp.bfloat16), w1_ref[...],
                preferred_element_type=jnp.float32)
    h = jnp.maximum(h + b1_ref[...], 0.0)          # f32 bias-add + ReLU (VPU)
    # fc3: relu(h @ W3 + b3).
    y = jnp.dot(h.astype(jnp.bfloat16), w3_ref[...],
                preferred_element_type=jnp.float32)
    y = jnp.maximum(y + b3_ref[...], 0.0)
    o_ref[...] = y.astype(o_ref.dtype)


def feature_model_forward(x, w1, b1, w3, b3, *, tile_b=1024):
    """relu(relu(x @ w1 + b1) @ w3 + b3).

    x:  [B, D] float32
    w1: [D, H], b1: [H]       (PyTorch fc1 weight, stored transposed)
    w3: [H, D], b3: [D]       (PyTorch fc3 weight, stored transposed)
    """
    B, D = x.shape
    H = w1.shape[1]
    assert w1.shape == (D, H) and w3.shape == (H, D)
    assert b1.shape[-1] == H and b3.shape[-1] == D

    # Sublane-aligned batch tile, never larger than round_up(B, 8). No jnp.pad:
    # the partial boundary tile is handled by Pallas (masked output writeback;
    # garbage rows never mix with valid rows since rows are independent).
    TB = min(_round_up(tile_b, _SUBLANE), _round_up(B, _SUBLANE))
    grid = (pl.cdiv(B, TB),)

    # Pre-cast weights to bf16 once in the wrapper; biases kept in f32.
    w1b = w1.astype(jnp.bfloat16)
    w3b = w3.astype(jnp.bfloat16)
    b1r = b1.reshape(1, H).astype(jnp.float32)
    b3r = b3.reshape(1, D).astype(jnp.float32)

    # TODO(synk): for large D*H (~2k x 2k and up) the VMEM-resident weight blocks
    # exceed v7x's 64 MiB VMEM; switch to a contraction grid axis + f32 VMEM
    # accumulator (init/finalize via pl.when) at that point.
    tile_bytes = TB * D * 4                              # one f32 (TB, D) tile
    weight_bytes = (D * H + H * D) * 2 + (H + D) * 4     # bf16 weights + f32 biases
    est_vmem = 2 * (2 * tile_bytes) + 2 * weight_bytes + (4 << 20)
    vmem_limit = min(max(est_vmem, 32 << 20), 96 << 20)

    cost = pl.CostEstimate(
        flops=4 * B * D * H,                       # two matmuls: 2*B*D*H each
        transcendentals=0,
        bytes_accessed=2 * B * D * 4 + weight_bytes,   # x read + out write + weights
    )

    return pl.pallas_call(
        _feature_kernel,
        out_shape=jax.ShapeDtypeStruct((B, D), jnp.float32),
        grid=grid,
        in_specs=[
            pl.BlockSpec((TB, D), lambda i: (i, 0)),   # x tile (auto double-buffered)
            pl.BlockSpec((D, H), lambda i: (0, 0)),    # w1 (VMEM-resident, bf16)
            pl.BlockSpec((1, H), lambda i: (0, 0)),    # b1 (f32)
            pl.BlockSpec((H, D), lambda i: (0, 0)),    # w3 (VMEM-resident, bf16)
            pl.BlockSpec((1, D), lambda i: (0, 0)),    # b3 (f32)
        ],
        out_specs=pl.BlockSpec((TB, D), lambda i: (i, 0)),
        compiler_params=pltpu.CompilerParams(
            dimension_semantics=("parallel",),
            vmem_limit_bytes=vmem_limit,
        ),
        cost_estimate=cost,
    )(x, w1b, b1r, w3b, b3r)


def init_params(key, input_shape, hidden=64):
    """PyTorch-style Linear init: U(-1/sqrt(fan_in), 1/sqrt(fan_in))."""
    k1, k2, k3, k4 = jax.random.split(key, 4)
    bound1 = 1.0 / (input_shape ** 0.5)
    bound3 = 1.0 / (hidden ** 0.5)
    w1 = jax.random.uniform(k1, (input_shape, hidden), jnp.float32,
                            minval=-bound1, maxval=bound1)
    b1 = jax.random.uniform(k2, (hidden,), jnp.float32,
                            minval=-bound1, maxval=bound1)
    w3 = jax.random.uniform(k3, (hidden, input_shape), jnp.float32,
                            minval=-bound3, maxval=bound3)
    b3 = jax.random.uniform(k4, (input_shape,), jnp.float32,
                            minval=-bound3, maxval=bound3)
    return w1, b1, w3, b3


if __name__ == "__main__":
    key = jax.random.PRNGKey(0)
    k_x, k_p = jax.random.split(key)

    B = 8     # batch
    D = 32    # input_shape (feature width)

    x = jax.random.normal(k_x, (B, D), jnp.float32)
    w1, b1, w3, b3 = init_params(k_p, D)

    def ref_bf16(xv):
        # dtype-matched reference: bf16 matmul operands, f32 accumulate.
        h = jnp.maximum(
            jnp.dot(xv.astype(jnp.bfloat16), w1.astype(jnp.bfloat16),
                    preferred_element_type=jnp.float32) + b1, 0.0)
        return jnp.maximum(
            jnp.dot(h.astype(jnp.bfloat16), w3.astype(jnp.bfloat16),
                    preferred_element_type=jnp.float32) + b3, 0.0)

    out = jax.block_until_ready(feature_model_forward(x, w1, b1, w3, b3))
    assert out.shape == (B, D)
    assert jnp.allclose(out, ref_bf16(x), atol=1e-3, rtol=1e-3)

    # Full-f32 PyTorch-equivalent semantics (loose tolerance: bf16 MXU inputs
    # introduce ~1e-2 level deviation, which is expected).
    ref_f32 = jnp.maximum(jnp.maximum(x @ w1 + b1, 0.0) @ w3 + b3, 0.0)
    assert jnp.allclose(out, ref_f32, atol=1e-1, rtol=1e-1)

    # Boundary-masking check: batch that is not a multiple of 8 or of the tile.
    x2 = jax.random.normal(jax.random.PRNGKey(1), (13, D), jnp.float32)
    out2 = jax.block_until_ready(feature_model_forward(x2, w1, b1, w3, b3))
    assert out2.shape == (13, D)
    assert jnp.allclose(out2, ref_bf16(x2), atol=1e-3, rtol=1e-3)

    print("KERNEL_OK")
</pallas_src>

<mosaic_0001>
module attributes {stable_mosaic.version = 11 : i64} {
  func.func @_feature_kernel(%arg0: i32, %arg1: memref<8x32xf32, #tpu.memory_space<vmem>>, %arg2: memref<32x64xbf16, #tpu.memory_space<vmem>>, %arg3: memref<1x64xf32, #tpu.memory_space<vmem>>, %arg4: memref<64x32xbf16, #tpu.memory_space<vmem>>, %arg5: memref<1x32xf32, #tpu.memory_space<vmem>>, %arg6: memref<8x32xf32, #tpu.memory_space<vmem>>) attributes {dimension_semantics = [#tpu.dimension_semantics<parallel>], iteration_bounds = array<i64: 1>, scalar_prefetch = 0 : i64, scratch_operands = 0 : i64, tpu.core_type = #tpu.core_type<tc>, window_params = [{transform_indices = @transform_0, window_bounds = array<i64: 8, 32>}, {pipeline_mode = #tpu.pipeline_mode<synchronous>, transform_indices = @transform_1, window_bounds = array<i64: 32, 64>}, {pipeline_mode = #tpu.pipeline_mode<synchronous>, transform_indices = @transform_2, window_bounds = array<i64: 1, 64>}, {pipeline_mode = #tpu.pipeline_mode<synchronous>, transform_indices = @transform_3, window_bounds = array<i64: 64, 32>}, {pipeline_mode = #tpu.pipeline_mode<synchronous>, transform_indices = @transform_4, window_bounds = array<i64: 1, 32>}, {transform_indices = @transform_5, window_bounds = array<i64: 8, 32>}]} {
    %c0 = arith.constant 0 : index
    %c0_0 = arith.constant 0 : index
    %0 = vector.load %arg1[%c0, %c0_0] : memref<8x32xf32, #tpu.memory_space<vmem>>, vector<8x32xf32>
    %1 = arith.truncf %0 : vector<8x32xf32> to vector<8x32xbf16>
    %c0_1 = arith.constant 0 : index
    %c0_2 = arith.constant 0 : index
    %2 = vector.load %arg2[%c0_1, %c0_2] : memref<32x64xbf16, #tpu.memory_space<vmem>>, vector<32x64xbf16>
    %cst = arith.constant dense<0.000000e+00> : vector<8x64xf32>
    %3 = tpu.matmul %1, %2, %cst {dimension_numbers = #tpu.dot_dimension_numbers<[1], [0], [0], [1], [0, 0, 1, 1], [], []>} : vector<8x32xbf16>, vector<32x64xbf16>, vector<8x64xf32> -> vector<8x64xf32>
    %c0_3 = arith.constant 0 : index
    %c0_4 = arith.constant 0 : index
    %4 = vector.load %arg3[%c0_3, %c0_4] : memref<1x64xf32, #tpu.memory_space<vmem>>, vector<1x64xf32>
    %5 = vector.broadcast %4 : vector<1x64xf32> to vector<8x64xf32>
    %6 = arith.addf %3, %5 : vector<8x64xf32>
    %cst_5 = arith.constant 0.000000e+00 : f32
    %7 = vector.broadcast %cst_5 : f32 to vector<8x64xf32>
    %8 = arith.maximumf %6, %7 : vector<8x64xf32>
    %9 = arith.truncf %8 : vector<8x64xf32> to vector<8x64xbf16>
    %c0_6 = arith.constant 0 : index
    %c0_7 = arith.constant 0 : index
    %10 = vector.load %arg4[%c0_6, %c0_7] : memref<64x32xbf16, #tpu.memory_space<vmem>>, vector<64x32xbf16>
    %cst_8 = arith.constant dense<0.000000e+00> : vector<8x32xf32>
    %11 = tpu.matmul %9, %10, %cst_8 {dimension_numbers = #tpu.dot_dimension_numbers<[1], [0], [0], [1], [0, 0, 1, 1], [], []>} : vector<8x64xbf16>, vector<64x32xbf16>, vector<8x32xf32> -> vector<8x32xf32>
    %c0_9 = arith.constant 0 : index
    %c0_10 = arith.constant 0 : index
    %12 = vector.load %arg5[%c0_9, %c0_10] : memref<1x32xf32, #tpu.memory_space<vmem>>, vector<1x32xf32>
    %13 = vector.broadcast %12 : vector<1x32xf32> to vector<8x32xf32>
    %14 = arith.addf %11, %13 : vector<8x32xf32>
    %cst_11 = arith.constant 0.000000e+00 : f32
    %15 = vector.broadcast %cst_11 : f32 to vector<8x32xf32>
    %16 = arith.maximumf %14, %15 : vector<8x32xf32>
    %c0_12 = arith.constant 0 : index
    %c0_13 = arith.constant 0 : index
    %17 = vector.load %arg6[%c0_12, %c0_13] : memref<8x32xf32, #tpu.memory_space<vmem>>, vector<8x32xf32>
    tpu.vector_store %arg6[%c0_12, %c0_13], %16 {strides = array<i32>} : memref<8x32xf32, #tpu.memory_space<vmem>>, vector<8x32xf32>,
    return
  }
  func.func @transform_0(%arg0: i32) -> (i32, i32) {
    %c0_i32 = arith.constant 0 : i32
    %c0_i32_0 = arith.constant 0 : i32
    return %arg0, %c0_i32 : i32, i32
  }
  func.func @transform_1(%arg0: i32) -> (i32, i32) {
    %c0_i32 = arith.constant 0 : i32
    %c0_i32_0 = arith.constant 0 : i32
    %c0_i32_1 = arith.constant 0 : i32
    return %c0_i32, %c0_i32_0 : i32, i32
  }
  func.func @transform_2(%arg0: i32) -> (i32, i32) {
    %c0_i32 = arith.constant 0 : i32
    %c0_i32_0 = arith.constant 0 : i32
    %c0_i32_1 = arith.constant 0 : i32
    return %c0_i32, %c0_i32_0 : i32, i32
  }
  func.func @transform_3(%arg0: i32) -> (i32, i32) {
    %c0_i32 = arith.constant 0 : i32
    %c0_i32_0 = arith.constant 0 : i32
    %c0_i32_1 = arith.constant 0 : i32
    return %c0_i32, %c0_i32_0 : i32, i32
  }
  func.func @transform_4(%arg0: i32) -> (i32, i32) {
    %c0_i32 = arith.constant 0 : i32
    %c0_i32_0 = arith.constant 0 : i32
    %c0_i32_1 = arith.constant 0 : i32
    return %c0_i32, %c0_i32_0 : i32, i32
  }
  func.func @transform_5(%arg0: i32) -> (i32, i32) {
    %c0_i32 = arith.constant 0 : i32
    %c0_i32_0 = arith.constant 0 : i32
    return %arg0, %c0_i32 : i32, i32
  }
}

</mosaic_0001>

<bundles_post_ra>
// kernel: tpu_custom_call.1
= control target key start
LH: loop header
LB: loop body
LE: loop exit
PB: predicated region body
PF: predicated region fallthrough
CT: control target
= control target key end

     0   :  { %v263_v1 = vmov 0.0   ;;  %vm264_vm0 = vmmov 0   ;;  %vm47_vm1 = vcmask 261120   ;;  %s337_s0 = inlined_call_operand.vmem [shape: f32[8,32], index: 0, kind: input, shape index: {}]   ;;  %s338_s1 = inlined_call_operand.vmem [shape: bf16[32,64], index: 1, kind: input, shape index: {}]   ;;  %s339_s2 = inlined_call_operand.vmem [shape: f32[1,64], index: 2, kind: input, shape index: {}]   ;;  %s340_s3 = inlined_call_operand.vmem [shape: bf16[64,32], index: 3, kind: input, shape index: {}]   ;;  %s341_s4 = inlined_call_operand.vmem [shape: f32[1,32], index: 4, kind: input, shape index: {}]   ;;  %s342_s5 = inlined_call_operand.hbm [shape: f32[8,32], index: 5, kind: output, shape index: {}]  }
   0x1   :  { %v233_v0 = vld [vmem:[%s338_s1] sm:$0xff]   ;;  %210 = vmatprep.subr.bf16.mxu0 %v263_v1  ;;  %v234_v2 = vld [vmem:[%s338_s1 + $0x8] sm:$0xff]   ;;  %218 = vmatprep.subr.bf16.mxu1 %v263_v1 }
   0x2   :  { %211 = vmatpush3.bf16.msra.mxu0 %v233_v0  ;;  %214 = vmatprep.mubr.msk.bf16.mxu0 %vm264_vm0, %v263_v1  ;;  %v22_v3 = vld [vmem:[%s337_s0] sm:$0xff]  ;;  %v236_v5 = vld [vmem:[%s340_s3 + $0x8] sm:$0xff]  }
   0x3   :  { %212 = vmatprep.subr.bf16.mxu0 %v263_v1  ;;  %v235_v4 = vld [vmem:[%s340_s3] sm:$0xff]   ;;  %226 = vmatprep.mubr.msk.bf16.mxu1 %vm264_vm0, %v263_v1  ;;  %v23_v6 = vpack.c.bf16 %v22_v3, %v22_v3 }
   0x4   :  { %219 = vmatpush3.bf16.msra.mxu1 %v235_v4 }
   0x5   :  { %220 = vmatprep.subr.bf16.mxu1 %v263_v1 }
   0x6   :  { %213 = vmatpush3.bf16.msra.mxu0 %v234_v2 }
   0x7   :  { %10 = vsyncpa [#allocation3], 0  ;;  %v237_v7 = vld [vmem:[%s340_s3 + $0x10] sm:$0xff]   ;;  %v238_v8 = vld [vmem:[%s340_s3 + $0x18] sm:$0xff]   ;;  %vm132_vm2 = vcmask 523264   ;;  %s265_s3 = smov [#allocation2]  }
   0x8   :  { %221 = vmatpush3.bf16.msra.mxu1 %v236_v5  ;;  %v192_v9 = vld [vmem:[%s339_s2] ss:$0 sm:$0xff]  ;;  %s184_s9 = sshll.u32 %s265_s3, 4  ;;  %s185_s9 = int_to_ptr.vmem [resolvable:$true] %s184_s9 }
   0x9   :  { %215 = vmatmul.mubr.msk.bf16.vlgmr.msra.gmra.mrb[0].mxu0 %vm47_vm1, %v23_v6  ;;  %222 = vmatprep.subr.bf16.mxu1 %v263_v1  ;;  %v196_v17 = vld [vmem:[%s341_s4] ss:$0 sm:$0xff]  ;;  %s239_s2 = scalar_lea.vmem %s185_s9, 128  ;;  %p244_p1 = scmp.lt.s32.totalorder %s185_s9, %s185_s9 }
   0xa   :  { %p240_p0 = scmp.ne.s32.totalorder %s185_s9, %s239_s2  ;;  %p245_p2 = scmp.lt.s32.totalorder %s239_s2, %s239_s2 }
   0xc   :  { %223 = vmatpush3.bf16.msra.mxu1 %v237_v7  ;;  %p246_p3 = por %p245_p2, %p244_p1 }
   0xd   :  { %224 = vmatprep.subr.bf16.mxu1 %v263_v1 }
   0xe   :  { %p247_p4 = pnand %p246_p3, %p240_p0 }
  0x10   :  { %225 = vmatpush3.bf16.msra.mxu1 %v238_v8 }
  0xdc   :  { %v85_v10 = vpop.f32.mrb[0].mxu0 }
  0xdd   :  { %v86_v11 = vadd.f32 %v192_v9, %v85_v10  ;;  %v216_v12 = vpop.f32.mrb[1].mxu0 }
  0xde   :  { %v88_v13 = vpop.f32.mrb[2].mxu0 }
  0xdf   :  { %v91_v14 = vmax.f32 %v86_v11, 0.0  ;;  %v217_v15 = vpop.f32.mrb[3].mxu0 }
  0xe1   :  { %v92_v16 = vpack.c.bf16 %v91_v14, %v91_v14 }
  0xe3   :  { %227 = vmatmul.mubr.msk.bf16.vlgmr.msra.gmra.mrb[0].mxu1 %vm132_vm2, %v92_v16 }
 0x1b6   :  { %v170_v18 = vpop.f32.mrb[0].mxu1 }
 0x1b7   :  { %v171_v19 = vadd.f32 %v196_v17, %v170_v18  ;;  %v228_v20 = vpop.f32.mrb[1].mxu1 }
 0x1b8   :  { %v173_v21 = vpop.f32.mrb[2].mxu1 }
 0x1b9   :  { %v176_v22 = vmax.f32 %v171_v19, 0.0  ;;  %v229_v23 = vpop.f32.mrb[3].mxu1 }
 0x1bb   :  { %177 = vst.msk [vmem:[#allocation2] sm:$0xff] %vm47_vm1, %v176_v22 }
 0x1bc   :  { %250 = shalt.err (!%p247_p4)
}
 0x1bd   :  { %s251_s11 = scalar_lea.hbm %s342_s5, 128 }
 0x1be   :  { %p252_p5 = scmp.ne.s32.totalorder %s342_s5, %s251_s11  ;;  %p255_p6 = scmp.lt.u32.totalorder %s251_s11, %s342_s5 }
 0x1c0   :  { %p257_p7 = pnand %p255_p6, %p252_p5 }
 0x1c2   :  { %260 = shalt.err (!%p257_p7)
}
 0x1c3   :  { %187 = dma.vmem_to_hbm [thread:$0]  %s185_s9, 128, %s342_s5, [#allocation3]  }
 0x1c4   :  { %261 = dma.done.wait [#allocation3], 128  }
 0x1c5   :  { %262 = vsyncadd [#allocation3], 4294967168 }
 0x1c6   :  { %191 = vsyncpa [#allocation3], 1 }

</bundles_post_ra>
